<compile_context>
chip_gen: v7x
topology: tpu7x:2x2x1
jax: 0.10.0
libtpu: 0.0.40
codegen_flags: <defaults>
</compile_context>

<pallas_src>
import math
import jax
import jax.numpy as jnp
from jax import lax
from jax.experimental import pallas as pl
from jax.experimental.pallas import tpu as pltpu

# Problem sizes (small, consistent with the module).
B = 2            # batch
N = 8            # sequence length
DMODEL = 32      # model dim
H = 4            # heads
D = DMODEL // H  # head dim
BN = B * N       # flattened (batch, seq) rows

# Contract the last dims of both operands (A @ B^T without materializing B^T).
_NT_DIMS = (((1,), (1,)), ((), ()))


def _msa_kernel(x_ref, wa_ref, wb_ref, mask_ref, bu_ref, o_ref):
    x = x_ref[...]                                   # (BN, DMODEL)
    mask = mask_ref[...]                             # (BN, BN) additive 0 / -1e30

    acc = jnp.zeros((BN, DMODEL), jnp.float32)
    for h in range(H):                               # H = 4, fully unrolled
        # Scores: x @ A_h @ x^T  (scale 1/sqrt(D) already folded into A_h).
        t = jnp.dot(x, wa_ref[h],
                    preferred_element_type=jnp.float32)          # (BN, DMODEL)
        s = lax.dot_general(t, x, _NT_DIMS,
                            preferred_element_type=jnp.float32)  # (BN, BN)
        s = s + mask                                             # batch block-diag bias
        s = s - jnp.max(s, axis=-1, keepdims=True)
        p = jnp.exp(s)
        p = p / jnp.sum(p, axis=-1, keepdims=True)               # exact normalization

        # Value + unify paths folded: P_h @ (x @ B_h), B_h = Wv_h^T Wu_h(block)^T.
        xb = jnp.dot(x, wb_ref[h],
                     preferred_element_type=jnp.float32)         # (BN, DMODEL)
        acc = acc + jnp.dot(p, xb, preferred_element_type=jnp.float32)

    o_ref[...] = (acc + bu_ref[...]).astype(o_ref.dtype)


def prepare_msa_params(wq, wk, wv, wu, bu):
    """One-time parameter prep (not per-call wrapper work).

    PyTorch nn.Linear stores weights as (out, in); y = x @ W^T.
      A_h = Wq_h^T @ Wk_h / sqrt(D)              (DMODEL, DMODEL)
      B_h = Wv_h^T @ Wu^T[h*D:(h+1)*D, :]        (DMODEL, DMODEL)
    plus the additive batch block-diagonal mask and the 2-D unify bias.
    """
    wqT, wkT, wvT, wuT = wq.T, wk.T, wv.T, wu.T
    scale = 1.0 / math.sqrt(D)
    wa = jnp.stack(
        [(wqT[:, h * D:(h + 1) * D] @ wkT[:, h * D:(h + 1) * D].T) * scale
         for h in range(H)], axis=0)                             # (H, DMODEL, DMODEL)
    wb = jnp.stack(
        [wvT[:, h * D:(h + 1) * D] @ wuT[h * D:(h + 1) * D, :]
         for h in range(H)], axis=0)                             # (H, DMODEL, DMODEL)

    grp = jnp.arange(BN, dtype=jnp.int32) // N                   # batch id per flattened row
    mask = jnp.where(grp[:, None] == grp[None, :], 0.0, -1e30).astype(jnp.float32)

    return wa, wb, mask, bu.reshape(1, DMODEL)


def msa_forward(x, wa, wb, mask, bu2):
    """x: (B, N, DMODEL)."""
    b, n, dm = x.shape
    x2d = x.reshape(b * n, dm)

    y2d = pl.pallas_call(
        _msa_kernel,
        out_shape=jax.ShapeDtypeStruct((b * n, dm), x.dtype),
        in_specs=[pl.BlockSpec(memory_space=pltpu.MemorySpace.VMEM)] * 5,
        out_specs=pl.BlockSpec(memory_space=pltpu.MemorySpace.VMEM),
    )(x2d, wa, wb, mask, bu2)
    return y2d.reshape(b, n, dm)


def msa_reference(x, wq, wk, wv, wu, bu):
    """Plain-JAX reference matching the PyTorch forward exactly."""
    b, n, dm = x.shape
    q = x @ wq.T
    k = x @ wk.T
    v = x @ wv.T
    qh = q.reshape(b, n, H, D).transpose(0, 2, 1, 3)             # (b, h, n, d)
    kh = k.reshape(b, n, H, D).transpose(0, 2, 1, 3)
    vh = v.reshape(b, n, H, D).transpose(0, 2, 1, 3)
    dot = jnp.einsum('bhqd,bhkd->bhqk', qh, kh) / math.sqrt(D)
    dot = jax.nn.softmax(dot, axis=-1)
    out = jnp.einsum('bhqk,bhkd->bhqd', dot, vh)
    out = out.transpose(0, 2, 1, 3).reshape(b, n, dm)
    return out @ wu.T + bu


if __name__ == "__main__":
    key = jax.random.PRNGKey(0)
    kx, kq, kk, kv, ku, kb = jax.random.split(key, 6)

    # Deterministic parameter init (PyTorch nn.Linear default-ish uniform scale).
    bound = 1.0 / math.sqrt(DMODEL)
    x = jax.random.normal(kx, (B, N, DMODEL), dtype=jnp.float32)
    wq = jax.random.uniform(kq, (DMODEL, DMODEL), minval=-bound, maxval=bound, dtype=jnp.float32)
    wk = jax.random.uniform(kk, (DMODEL, DMODEL), minval=-bound, maxval=bound, dtype=jnp.float32)
    wv = jax.random.uniform(kv, (DMODEL, DMODEL), minval=-bound, maxval=bound, dtype=jnp.float32)
    wu = jax.random.uniform(ku, (DMODEL, DMODEL), minval=-bound, maxval=bound, dtype=jnp.float32)
    bu = jax.random.uniform(kb, (DMODEL,), minval=-bound, maxval=bound, dtype=jnp.float32)

    # Parameter folding / mask construction is done ONCE here, not per forward call.
    wa, wb, mask, bu2 = prepare_msa_params(wq, wk, wv, wu, bu)

    out = msa_forward(x, wa, wb, mask, bu2)
    out = jax.block_until_ready(out)

    ref = msa_reference(x, wq, wk, wv, wu, bu)
    assert out.shape == (B, N, DMODEL), out.shape
    err = float(jnp.max(jnp.abs(out - ref)))
    assert jnp.allclose(out, ref, atol=1e-4, rtol=1e-4), err

    print("KERNEL_OK")
</pallas_src>

<mosaic_0001>
module attributes {stable_mosaic.version = 11 : i64} {
  func.func @_msa_kernel(%arg0: memref<16x32xf32, #tpu.memory_space<vmem>>, %arg1: memref<4x32x32xf32, #tpu.memory_space<vmem>>, %arg2: memref<4x32x32xf32, #tpu.memory_space<vmem>>, %arg3: memref<16x16xf32, #tpu.memory_space<vmem>>, %arg4: memref<1x32xf32, #tpu.memory_space<vmem>>, %arg5: memref<16x32xf32, #tpu.memory_space<vmem>>) attributes {dimension_semantics = [], scalar_prefetch = 0 : i64, scratch_operands = 0 : i64, tpu.core_type = #tpu.core_type<tc>} {
    %c0 = arith.constant 0 : index
    %c0_0 = arith.constant 0 : index
    %0 = vector.load %arg0[%c0, %c0_0] : memref<16x32xf32, #tpu.memory_space<vmem>>, vector<16x32xf32>
    %c0_1 = arith.constant 0 : index
    %c0_2 = arith.constant 0 : index
    %1 = vector.load %arg3[%c0_1, %c0_2] : memref<16x16xf32, #tpu.memory_space<vmem>>, vector<16x16xf32>
    %cst = arith.constant 0.000000e+00 : f32
    %2 = vector.broadcast %cst : f32 to vector<16x32xf32>
    %c0_3 = arith.constant 0 : index
    %c0_4 = arith.constant 0 : index
    %c0_5 = arith.constant 0 : index
    %3 = vector.load %arg1[%c0_3, %c0_4, %c0_5] : memref<4x32x32xf32, #tpu.memory_space<vmem>>, vector<1x32x32xf32>
    %4 = vector.shape_cast %3 : vector<1x32x32xf32> to vector<32x32xf32>
    %cst_6 = arith.constant dense<0.000000e+00> : vector<16x32xf32>
    %5 = tpu.matmul %0, %4, %cst_6 {dimension_numbers = #tpu.dot_dimension_numbers<[1], [0], [0], [1], [0, 0, 1, 1], [], []>} : vector<16x32xf32>, vector<32x32xf32>, vector<16x32xf32> -> vector<16x32xf32>
    %cst_7 = arith.constant dense<0.000000e+00> : vector<16x16xf32>
    %6 = tpu.matmul %5, %0, %cst_7 {dimension_numbers = #tpu.dot_dimension_numbers<[1], [1], [0], [0], [0, 0, 1, 0], [], []>} : vector<16x32xf32>, vector<16x32xf32>, vector<16x16xf32> -> vector<16x16xf32>
    %7 = arith.addf %6, %1 : vector<16x16xf32>
    %cst_8 = arith.constant dense<0xFF800000> : vector<16xf32>
    %8 = vector.multi_reduction <maximumf>, %7, %cst_8 [1] : vector<16x16xf32> to vector<16xf32>
    %9 = vector.shape_cast %8 : vector<16xf32> to vector<16x1xf32>
    %10 = vector.broadcast %9 : vector<16x1xf32> to vector<16x16xf32>
    %11 = arith.subf %7, %10 : vector<16x16xf32>
    %12 = math.exp %11 : vector<16x16xf32>
    %cst_9 = arith.constant dense<0.000000e+00> : vector<16xf32>
    %13 = vector.multi_reduction <add>, %12, %cst_9 [1] : vector<16x16xf32> to vector<16xf32>
    %14 = vector.shape_cast %13 : vector<16xf32> to vector<16x1xf32>
    %15 = vector.broadcast %14 : vector<16x1xf32> to vector<16x16xf32>
    %16 = arith.divf %12, %15 : vector<16x16xf32>
    %c0_10 = arith.constant 0 : index
    %c0_11 = arith.constant 0 : index
    %c0_12 = arith.constant 0 : index
    %17 = vector.load %arg2[%c0_10, %c0_11, %c0_12] : memref<4x32x32xf32, #tpu.memory_space<vmem>>, vector<1x32x32xf32>
    %18 = vector.shape_cast %17 : vector<1x32x32xf32> to vector<32x32xf32>
    %cst_13 = arith.constant dense<0.000000e+00> : vector<16x32xf32>
    %19 = tpu.matmul %0, %18, %cst_13 {dimension_numbers = #tpu.dot_dimension_numbers<[1], [0], [0], [1], [0, 0, 1, 1], [], []>} : vector<16x32xf32>, vector<32x32xf32>, vector<16x32xf32> -> vector<16x32xf32>
    %cst_14 = arith.constant dense<0.000000e+00> : vector<16x32xf32>
    %20 = tpu.matmul %16, %19, %cst_14 {dimension_numbers = #tpu.dot_dimension_numbers<[1], [0], [0], [1], [0, 0, 1, 1], [], []>} : vector<16x16xf32>, vector<16x32xf32>, vector<16x32xf32> -> vector<16x32xf32>
    %21 = arith.addf %2, %20 : vector<16x32xf32>
    %c1 = arith.constant 1 : index
    %c0_15 = arith.constant 0 : index
    %c0_16 = arith.constant 0 : index
    %22 = vector.load %arg1[%c1, %c0_15, %c0_16] : memref<4x32x32xf32, #tpu.memory_space<vmem>>, vector<1x32x32xf32>
    %23 = vector.shape_cast %22 : vector<1x32x32xf32> to vector<32x32xf32>
    %cst_17 = arith.constant dense<0.000000e+00> : vector<16x32xf32>
    %24 = tpu.matmul %0, %23, %cst_17 {dimension_numbers = #tpu.dot_dimension_numbers<[1], [0], [0], [1], [0, 0, 1, 1], [], []>} : vector<16x32xf32>, vector<32x32xf32>, vector<16x32xf32> -> vector<16x32xf32>
    %cst_18 = arith.constant dense<0.000000e+00> : vector<16x16xf32>
    %25 = tpu.matmul %24, %0, %cst_18 {dimension_numbers = #tpu.dot_dimension_numbers<[1], [1], [0], [0], [0, 0, 1, 0], [], []>} : vector<16x32xf32>, vector<16x32xf32>, vector<16x16xf32> -> vector<16x16xf32>
    %26 = arith.addf %25, %1 : vector<16x16xf32>
    %cst_19 = arith.constant dense<0xFF800000> : vector<16xf32>
    %27 = vector.multi_reduction <maximumf>, %26, %cst_19 [1] : vector<16x16xf32> to vector<16xf32>
    %28 = vector.shape_cast %27 : vector<16xf32> to vector<16x1xf32>
    %29 = vector.broadcast %28 : vector<16x1xf32> to vector<16x16xf32>
    %30 = arith.subf %26, %29 : vector<16x16xf32>
    %31 = math.exp %30 : vector<16x16xf32>
    %cst_20 = arith.constant dense<0.000000e+00> : vector<16xf32>
    %32 = vector.multi_reduction <add>, %31, %cst_20 [1] : vector<16x16xf32> to vector<16xf32>
    %33 = vector.shape_cast %32 : vector<16xf32> to vector<16x1xf32>
    %34 = vector.broadcast %33 : vector<16x1xf32> to vector<16x16xf32>
    %35 = arith.divf %31, %34 : vector<16x16xf32>
    %c1_21 = arith.constant 1 : index
    %c0_22 = arith.constant 0 : index
    %c0_23 = arith.constant 0 : index
    %36 = vector.load %arg2[%c1_21, %c0_22, %c0_23] : memref<4x32x32xf32, #tpu.memory_space<vmem>>, vector<1x32x32xf32>
    %37 = vector.shape_cast %36 : vector<1x32x32xf32> to vector<32x32xf32>
    %cst_24 = arith.constant dense<0.000000e+00> : vector<16x32xf32>
    %38 = tpu.matmul %0, %37, %cst_24 {dimension_numbers = #tpu.dot_dimension_numbers<[1], [0], [0], [1], [0, 0, 1, 1], [], []>} : vector<16x32xf32>, vector<32x32xf32>, vector<16x32xf32> -> vector<16x32xf32>
    %cst_25 = arith.constant dense<0.000000e+00> : vector<16x32xf32>
    %39 = tpu.matmul %35, %38, %cst_25 {dimension_numbers = #tpu.dot_dimension_numbers<[1], [0], [0], [1], [0, 0, 1, 1], [], []>} : vector<16x16xf32>, vector<16x32xf32>, vector<16x32xf32> -> vector<16x32xf32>
    %40 = arith.addf %21, %39 : vector<16x32xf32>
    %c2 = arith.constant 2 : index
    %c0_26 = arith.constant 0 : index
    %c0_27 = arith.constant 0 : index
    %41 = vector.load %arg1[%c2, %c0_26, %c0_27] : memref<4x32x32xf32, #tpu.memory_space<vmem>>, vector<1x32x32xf32>
    %42 = vector.shape_cast %41 : vector<1x32x32xf32> to vector<32x32xf32>
    %cst_28 = arith.constant dense<0.000000e+00> : vector<16x32xf32>
    %43 = tpu.matmul %0, %42, %cst_28 {dimension_numbers = #tpu.dot_dimension_numbers<[1], [0], [0], [1], [0, 0, 1, 1], [], []>} : vector<16x32xf32>, vector<32x32xf32>, vector<16x32xf32> -> vector<16x32xf32>
    %cst_29 = arith.constant dense<0.000000e+00> : vector<16x16xf32>
    %44 = tpu.matmul %43, %0, %cst_29 {dimension_numbers = #tpu.dot_dimension_numbers<[1], [1], [0], [0], [0, 0, 1, 0], [], []>} : vector<16x32xf32>, vector<16x32xf32>, vector<16x16xf32> -> vector<16x16xf32>
    %45 = arith.addf %44, %1 : vector<16x16xf32>
    %cst_30 = arith.constant dense<0xFF800000> : vector<16xf32>
    %46 = vector.multi_reduction <maximumf>, %45, %cst_30 [1] : vector<16x16xf32> to vector<16xf32>
    %47 = vector.shape_cast %46 : vector<16xf32> to vector<16x1xf32>
    %48 = vector.broadcast %47 : vector<16x1xf32> to vector<16x16xf32>
    %49 = arith.subf %45, %48 : vector<16x16xf32>
    %50 = math.exp %49 : vector<16x16xf32>
    %cst_31 = arith.constant dense<0.000000e+00> : vector<16xf32>
    %51 = vector.multi_reduction <add>, %50, %cst_31 [1] : vector<16x16xf32> to vector<16xf32>
    %52 = vector.shape_cast %51 : vector<16xf32> to vector<16x1xf32>
    %53 = vector.broadcast %52 : vector<16x1xf32> to vector<16x16xf32>
    %54 = arith.divf %50, %53 : vector<16x16xf32>
    %c2_32 = arith.constant 2 : index
    %c0_33 = arith.constant 0 : index
    %c0_34 = arith.constant 0 : index
    %55 = vector.load %arg2[%c2_32, %c0_33, %c0_34] : memref<4x32x32xf32, #tpu.memory_space<vmem>>, vector<1x32x32xf32>
    %56 = vector.shape_cast %55 : vector<1x32x32xf32> to vector<32x32xf32>
    %cst_35 = arith.constant dense<0.000000e+00> : vector<16x32xf32>
    %57 = tpu.matmul %0, %56, %cst_35 {dimension_numbers = #tpu.dot_dimension_numbers<[1], [0], [0], [1], [0, 0, 1, 1], [], []>} : vector<16x32xf32>, vector<32x32xf32>, vector<16x32xf32> -> vector<16x32xf32>
    %cst_36 = arith.constant dense<0.000000e+00> : vector<16x32xf32>
    %58 = tpu.matmul %54, %57, %cst_36 {dimension_numbers = #tpu.dot_dimension_numbers<[1], [0], [0], [1], [0, 0, 1, 1], [], []>} : vector<16x16xf32>, vector<16x32xf32>, vector<16x32xf32> -> vector<16x32xf32>
    %59 = arith.addf %40, %58 : vector<16x32xf32>
    %c3 = arith.constant 3 : index
    %c0_37 = arith.constant 0 : index
    %c0_38 = arith.constant 0 : index
    %60 = vector.load %arg1[%c3, %c0_37, %c0_38] : memref<4x32x32xf32, #tpu.memory_space<vmem>>, vector<1x32x32xf32>
    %61 = vector.shape_cast %60 : vector<1x32x32xf32> to vector<32x32xf32>
    %cst_39 = arith.constant dense<0.000000e+00> : vector<16x32xf32>
    %62 = tpu.matmul %0, %61, %cst_39 {dimension_numbers = #tpu.dot_dimension_numbers<[1], [0], [0], [1], [0, 0, 1, 1], [], []>} : vector<16x32xf32>, vector<32x32xf32>, vector<16x32xf32> -> vector<16x32xf32>
    %cst_40 = arith.constant dense<0.000000e+00> : vector<16x16xf32>
    %63 = tpu.matmul %62, %0, %cst_40 {dimension_numbers = #tpu.dot_dimension_numbers<[1], [1], [0], [0], [0, 0, 1, 0], [], []>} : vector<16x32xf32>, vector<16x32xf32>, vector<16x16xf32> -> vector<16x16xf32>
    %64 = arith.addf %63, %1 : vector<16x16xf32>
    %cst_41 = arith.constant dense<0xFF800000> : vector<16xf32>
    %65 = vector.multi_reduction <maximumf>, %64, %cst_41 [1] : vector<16x16xf32> to vector<16xf32>
    %66 = vector.shape_cast %65 : vector<16xf32> to vector<16x1xf32>
    %67 = vector.broadcast %66 : vector<16x1xf32> to vector<16x16xf32>
    %68 = arith.subf %64, %67 : vector<16x16xf32>
    %69 = math.exp %68 : vector<16x16xf32>
    %cst_42 = arith.constant dense<0.000000e+00> : vector<16xf32>
    %70 = vector.multi_reduction <add>, %69, %cst_42 [1] : vector<16x16xf32> to vector<16xf32>
    %71 = vector.shape_cast %70 : vector<16xf32> to vector<16x1xf32>
    %72 = vector.broadcast %71 : vector<16x1xf32> to vector<16x16xf32>
    %73 = arith.divf %69, %72 : vector<16x16xf32>
    %c3_43 = arith.constant 3 : index
    %c0_44 = arith.constant 0 : index
    %c0_45 = arith.constant 0 : index
    %74 = vector.load %arg2[%c3_43, %c0_44, %c0_45] : memref<4x32x32xf32, #tpu.memory_space<vmem>>, vector<1x32x32xf32>
    %75 = vector.shape_cast %74 : vector<1x32x32xf32> to vector<32x32xf32>
    %cst_46 = arith.constant dense<0.000000e+00> : vector<16x32xf32>
    %76 = tpu.matmul %0, %75, %cst_46 {dimension_numbers = #tpu.dot_dimension_numbers<[1], [0], [0], [1], [0, 0, 1, 1], [], []>} : vector<16x32xf32>, vector<32x32xf32>, vector<16x32xf32> -> vector<16x32xf32>
    %cst_47 = arith.constant dense<0.000000e+00> : vector<16x32xf32>
    %77 = tpu.matmul %73, %76, %cst_47 {dimension_numbers = #tpu.dot_dimension_numbers<[1], [0], [0], [1], [0, 0, 1, 1], [], []>} : vector<16x16xf32>, vector<16x32xf32>, vector<16x32xf32> -> vector<16x32xf32>
    %78 = arith.addf %59, %77 : vector<16x32xf32>
    %c0_48 = arith.constant 0 : index
    %c0_49 = arith.constant 0 : index
    %79 = vector.load %arg4[%c0_48, %c0_49] : memref<1x32xf32, #tpu.memory_space<vmem>>, vector<1x32xf32>
    %80 = vector.broadcast %79 : vector<1x32xf32> to vector<16x32xf32>
    %81 = arith.addf %78, %80 : vector<16x32xf32>
    %c0_50 = arith.constant 0 : index
    %c0_51 = arith.constant 0 : index
    %82 = vector.load %arg5[%c0_50, %c0_51] : memref<16x32xf32, #tpu.memory_space<vmem>>, vector<16x32xf32>
    tpu.vector_store %arg5[%c0_50, %c0_51], %81 {strides = array<i32>} : memref<16x32xf32, #tpu.memory_space<vmem>>, vector<16x32xf32>,
    return
  }
}

</mosaic_0001>

<bundles_post_ra>
// kernel: tpu_custom_call.1
= control target key start
LH: loop header
LB: loop body
LE: loop exit
PB: predicated region body
PF: predicated region fallthrough
CT: control target
= control target key end

     0   :  { %10 = vsyncpa [#allocation3], 0  ;;  %s2277_s0 = inlined_call_operand.hbm [shape: f32[16,32], index: 0, kind: input, shape index: {}]   ;;  %s2278_s1 = inlined_call_operand.hbm [shape: f32[4,32,32], index: 1, kind: input, shape index: {}]   ;;  %s2279_s2 = inlined_call_operand.hbm [shape: f32[4,32,32], index: 2, kind: input, shape index: {}]   ;;  %s2280_s3 = inlined_call_operand.hbm [shape: f32[16,16], index: 3, kind: input, shape index: {}]   ;;  %s2281_s4 = inlined_call_operand.vmem [shape: f32[1,32], index: 4, kind: input, shape index: {}]   ;;  %s2282_s5 = inlined_call_operand.hbm [shape: f32[16,32], index: 5, kind: output, shape index: {}]  }
   0x1   :  { %11 = vsyncpa [#allocation6], 0 }
   0x2   :  { %12 = vsyncpa [#allocation9], 0 }
   0x3   :  { %13 = vsyncpa [#allocation4], 0  ;;  %s2028_s18 = smov [#allocation5]   ;;  %s2029_s20 = smov [#allocation2]  }
   0x4   :  { %s31_s19 = sshll.u32 %s2028_s18, 4  ;;  %s19_s21 = sshll.u32 %s2029_s20, 4  ;;  %s32_s19 = int_to_ptr.vmem [resolvable:$true] %s31_s19  ;;  %s2065_s21 = int_to_ptr.vmem [resolvable:$true] %s19_s21 }
   0x5   :  { %s1910_s24 = scalar_lea.hbm %s2278_s1, 2048 }
   0x6   :  { %p1911_p0 = scmp.ne.s32.totalorder %s2278_s1, %s1910_s24  ;;  %p1914_p1 = scmp.lt.u32.totalorder %s1910_s24, %s2278_s1 }
   0x8   :  { %p1916_p2 = pnand %p1914_p1, %p1911_p0 }
   0xa   :  { %1919 = shalt.err (!%p1916_p2)
}
   0xb   :  { %s1920_s29 = scalar_lea.vmem %s32_s19, 2048  ;;  %p1925_p4 = scmp.lt.s32.totalorder %s32_s19, %s32_s19 }
   0xc   :  { %p1921_p3 = scmp.ne.s32.totalorder %s32_s19, %s1920_s29  ;;  %p1926_p5 = scmp.lt.s32.totalorder %s1920_s29, %s1920_s29 }
   0xe   :  { %p1927_p6 = por %p1926_p5, %p1925_p4 }
  0x10   :  { %p1928_p7 = pnand %p1927_p6, %p1921_p3 }
  0x12   :  { %1931 = shalt.err (!%p1928_p7)
}
  0x13   :  { %s2030_s30 = smov 128   ;;  %s2031_s6 = smov 8  }
  0x14   :  { %37 = dma.hbm_to_vmem [thread:$0]  %s2278_s1, 2048, %s32_s19, [#allocation6], %s2030_s30, %s2030_s30, %s2031_s6  }
  0x15   :  { %s1932_s11 = scalar_lea.hbm %s2277_s0, 256 }
  0x16   :  { %p1933_p8 = scmp.ne.s32.totalorder %s2277_s0, %s1932_s11  ;;  %p1936_p9 = scmp.lt.u32.totalorder %s1932_s11, %s2277_s0 }
  0x18   :  { %p1938_p10 = pnand %p1936_p9, %p1933_p8 }
  0x1a   :  { %1941 = shalt.err (!%p1938_p10)
}
  0x1b   :  { %s1942_s16 = scalar_lea.vmem %s2065_s21, 256  ;;  %p1947_p12 = scmp.lt.s32.totalorder %s2065_s21, %s2065_s21 }
  0x1c   :  { %p1943_p11 = scmp.ne.s32.totalorder %s2065_s21, %s1942_s16  ;;  %p1948_p13 = scmp.lt.s32.totalorder %s1942_s16, %s1942_s16 }
  0x1e   :  { %p1949_p0 = por %p1948_p13, %p1947_p12 }
  0x20   :  { %p1950_p1 = pnand %p1949_p0, %p1943_p11 }
  0x22   :  { %1953 = shalt.err (!%p1950_p1)
}
  0x23   :  { %25 = dma.hbm_to_vmem [thread:$0]  %s2277_s0, 256, %s2065_s21, [#allocation3], %s2030_s30, %s2030_s30, %s2031_s6  }
  0x24   :  { %s2032_s18 = smov [#allocation7]   ;;  %s2033_s20 = smov [#allocation8]  }
  0x25   :  { %s43_s19 = sshll.u32 %s2032_s18, 4  ;;  %s55_s22 = sshll.u32 %s2033_s20, 4  ;;  %s44_s19 = int_to_ptr.vmem [resolvable:$true] %s43_s19  ;;  %s2102_s22 = int_to_ptr.vmem [resolvable:$true] %s55_s22 }
  0x26   :  { %s1954_s25 = scalar_lea.hbm %s2279_s2, 2048 }
  0x27   :  { %p1955_p2 = scmp.ne.s32.totalorder %s2279_s2, %s1954_s25  ;;  %p1958_p3 = scmp.lt.u32.totalorder %s1954_s25, %s2279_s2 }
  0x29   :  { %p1960_p4 = pnand %p1958_p3, %p1955_p2 }
  0x2b   :  { %1963 = shalt.err (!%p1960_p4)
}
  0x2c   :  { %s1964_s0 = scalar_lea.vmem %s44_s19, 2048  ;;  %p1969_p6 = scmp.lt.s32.totalorder %s44_s19, %s44_s19 }
  0x2d   :  { %p1965_p5 = scmp.ne.s32.totalorder %s44_s19, %s1964_s0  ;;  %p1970_p7 = scmp.lt.s32.totalorder %s1964_s0, %s1964_s0 }
  0x2f   :  { %p1971_p8 = por %p1970_p7, %p1969_p6 }
  0x31   :  { %p1972_p9 = pnand %p1971_p8, %p1965_p5 }
  0x33   :  { %1975 = shalt.err (!%p1972_p9)
}
  0x34   :  { %49 = dma.hbm_to_vmem [thread:$0]  %s2279_s2, 2048, %s44_s19, [#allocation6], %s2030_s30, %s2030_s30, %s2031_s6  }
  0x35   :  { %s1976_s10 = scalar_lea.hbm %s2280_s3, 256 }
  0x36   :  { %p1977_p10 = scmp.ne.s32.totalorder %s2280_s3, %s1976_s10  ;;  %p1980_p11 = scmp.lt.u32.totalorder %s1976_s10, %s2280_s3 }
  0x38   :  { %p1982_p12 = pnand %p1980_p11, %p1977_p10 }
  0x3a   :  { %1985 = shalt.err (!%p1982_p12)
}
  0x3b   :  { %s1986_s15 = scalar_lea.vmem %s2102_s22, 256  ;;  %p1991_p0 = scmp.lt.s32.totalorder %s2102_s22, %s2102_s22 }
  0x3c   :  { %p1987_p13 = scmp.ne.s32.totalorder %s2102_s22, %s1986_s15  ;;  %p1992_p1 = scmp.lt.s32.totalorder %s1986_s15, %s1986_s15 }
  0x3e   :  { %p1993_p2 = por %p1992_p1, %p1991_p0 }
  0x40   :  { %p1994_p3 = pnand %p1993_p2, %p1987_p13 }
  0x42   :  { %1997 = shalt.err (!%p1994_p3)
}
  0x43   :  { %61 = dma.hbm_to_vmem [thread:$0]  %s2280_s3, 256, %s2102_s22, [#allocation9], %s2030_s30, %s2030_s30, %s2031_s6  }
  0x44   :  { %2020 = dma.done.wait [#allocation3], 256  }
  0x45   :  { %2021 = vsyncadd [#allocation3], 4294967040 }
  0x46   :  { %2022 = dma.done.wait [#allocation6], 4096  }
  0x47   :  { %2023 = vsyncadd [#allocation6], 4294963200 }
  0x48   :  { %2024 = dma.done.wait [#allocation9], 256  }
  0x49   :  { %2025 = vsyncadd [#allocation9], 4294967040  ;;  %vm84_vm0 = vcmask 261120   ;;  %v80_v1 = vld [vmem:[#allocation5] sm:$0xff]  ;;  %v81_v2 = vld [vmem:[#allocation5 + $0x8] sm:$0xff]  ;;  %vm247_vm2 = vcmask 130048  }
  0x4a   :  { %vm2141_vm1 = vmpackc.low %vm84_vm0, %vm84_vm0  ;;  %v82_v3 = vld [vmem:[#allocation5 + $0x10] sm:$0xff]  ;;  %v1761_v4 = vpack.c.bf16 %v81_v2, %v80_v1  ;;  %v83_v5 = vld [vmem:[#allocation5 + $0x18] sm:$0xff]  ;;  %s2034_s17 = smov [#allocation10]  }
  0x4b   :  { %v2145_v6 = vld [vmem:[#allocation2] sm:$0xff]  ;;  %v2147_v7 = vld [vmem:[#allocation2 + $0x8] sm:$0xff]  ;;  %v1765_v8 = vpack.c.bf16 %v83_v5, %v82_v3  ;;  %v350_v10 = vld [vmem:[#allocation5 + $0x20] sm:$0xff]  ;;  %s1482_s18 = sshll.u32 %s2034_s17, 4  ;;  %s1483_s18 = int_to_ptr.vmem [resolvable:$true] %s1482_s18 }
  0x4c   :  { %1625 = vmatprep.mubr.msk.f32.mxu0 %vm84_vm0, %v2145_v6  ;;  %v2153_v9 = vpack.c.bf16 %v2147_v7, %v2145_v6  ;;  %1762 = vmatprep.subr.bf16.mxu0 %v1761_v4  ;;  %v351_v11 = vld [vmem:[#allocation5 + $0x28] sm:$0xff]  ;;  %v270_v13 = vld [vmem:[#allocation7] sm:$0xff]  ;;  %v272_v16 = vld [vmem:[#allocation7 + $0x10] sm:$0xff]  ;;  %s1998_s19 = scalar_lea.vmem %s1483_s18, 256  ;;  %p2003_p5 = scmp.lt.s32.totalorder %s1483_s18, %s1483_s18 }
  0x4d   :  { %1764 = vmatpush3.bf16.msra.mxu0 %v1761_v4  ;;  %v1783_v12 = vpack.c.bf16 %v351_v11, %v350_v10  ;;  %v271_v14 = vld [vmem:[#allocation7 + $0x8] sm:$0xff]  ;;  %v273_v17 = vld [vmem:[#allocation7 + $0x18] sm:$0xff]  ;;  %v352_v19 = vld [vmem:[#allocation5 + $0x30] sm:$0xff]  ;;  %p1999_p4 = scmp.ne.s32.totalorder %s1483_s18, %s1998_s19  ;;  %p2004_p6 = scmp.lt.s32.totalorder %s1998_s19, %s1998_s19 }
  0x4e   :  { %1771 = vmatprep.subr.msk.bf16.mxu1 %vm2141_vm1, %v2153_v9  ;;  %1766 = vmatprep.subr.bf16.mxu0 %v1765_v8  ;;  %v1775_v15 = vpack.c.bf16 %v271_v14, %v270_v13  ;;  %v1779_v18 = vpack.c.bf16 %v273_v17, %v272_v16  ;;  %v353_v20 = vld [vmem:[#allocation5 + $0x38] sm:$0xff]  ;;  %v533_v24 = vld [vmem:[#allocation7 + $0x20] sm:$0xff]  ;;  %v534_v25 = vld [vmem:[#allocation7 + $0x28] sm:$0xff] }
  0x4f   :  { %1774 = vmatpush3.bf16.xpose.msk.msra.mxu1 %vm2141_vm1, %v2153_v9  ;;  %v1787_v23 = vpack.c.bf16 %v353_v20, %v352_v19  ;;  %v1797_v26 = vpack.c.bf16 %v534_v25, %v533_v24  ;;  %v535_v27 = vld [vmem:[#allocation7 + $0x30] sm:$0xff]  ;;  %v536_v28 = vld [vmem:[#allocation7 + $0x38] sm:$0xff]  ;;  %v2185_v30 = vld [vmem:[#allocation8] sm:$0xff]  ;;  %p2005_p7 = por %p2004_p6, %p2003_p5 }
  0x50   :  { %1784 = vmatprep.subr.bf16.mxu1 %v1783_v12  ;;  %v1801_v29 = vpack.c.bf16 %v536_v28, %v535_v27  ;;  %v2187_v32 = vld [vmem:[#allocation8 + $0x8] sm:$0xff]  ;;  %v775_v46 = vld [vmem:[#allocation5 + $0x40] sm:$0xff]  ;;  %v777_v48 = vld [vmem:[#allocation5 + $0x50] sm:$0xff] }
  0x51   :  { %1768 = vmatpush3.bf16.msra.mxu0 %v1765_v8  ;;  %v776_v47 = vld [vmem:[#allocation5 + $0x48] sm:$0xff]  ;;  %v778_v50 = vld [vmem:[#allocation5 + $0x58] sm:$0xff]  ;;  %p2006_p8 = pnand %p2005_p7, %p1999_p4 }
  0x52   :  { %1776 = vmatprep.subr.bf16.mxu0 %v1775_v15  ;;  %v1813_v49 = vpack.c.bf16 %v776_v47, %v775_v46  ;;  %v1817_v51 = vpack.c.bf16 %v778_v50, %v777_v48 }
  0x54   :  { %1626 = vmatmul.mubr.msk.f32.vlgmr.msra.gmra.mrb[0].mxu0 %vm84_vm0, %v2147_v7 }
  0x55   :  { %1643 = vmatprep.mubr.msk.f32.mxu0 %vm84_vm0, %v2145_v6  ;;  %1778 = vmatpush3.bf16.msra.mxu0 %v1775_v15 }
  0x56   :  { %1780 = vmatprep.subr.bf16.mxu0 %v1779_v18 }
  0x59   :  { %1782 = vmatpush3.bf16.msra.mxu0 %v1779_v18 }
  0x5a   :  { %1793 = vmatprep.subr.msk.bf16.mxu0 %vm2141_vm1, %v2153_v9 }
  0x5c   :  { %1644 = vmatmul.mubr.msk.f32.vlgmr.msra.gmra.mrb[2].mxu0 %vm84_vm0, %v2147_v7 }
  0x62   :  { %1796 = vmatpush3.bf16.xpose.msk.msra.mxu0 %vm2141_vm1, %v2153_v9 }
 0x127   :  { %v1627_v21 = vpop.f32.mrb[0].mxu0 }
 0x128   :  { %v157_v22 = vpop.f32.mrb[1].mxu0 }
 0x129   :  { %1632 = vmatprep.mubr.msk.f32.mxu1 %vm84_vm0, %v157_v22 }
 0x12a   :  { %1633 = vmatmul.mubr.msk.f32.vlgmr.msra.gmra.mrb[0].mxu1 %vm84_vm0, %v1627_v21 }
 0x12b   :  { %1786 = vmatpush3.bf16.msra.mxu1 %v1783_v12  ;;  %1654 = vmatprep.mubr.msk.f32.mxu1 %vm84_vm0, %v2145_v6 }
 0x12c   :  { %1788 = vmatprep.subr.bf16.mxu1 %v1787_v23 }
 0x12f   :  { %1790 = vmatpush3.bf16.msra.mxu1 %v1787_v23  ;;  %v1645_v41 = vpop.f32.mrb[2].mxu0 }
 0x130   :  { %1798 = vmatprep.subr.bf16.mxu1 %v1797_v26  ;;  %v340_v43 = vpop.f32.mrb[3].mxu0 }
 0x131   :  { %v2195_v45 = vpack.c.bf16 %v1645_v41, %v340_v43  ;;  %v1122_v41 = vld [vmem:[#allocation5 + $0x68] sm:$0xff]  ;;  %v1123_v43 = vld [vmem:[#allocation5 + $0x70] sm:$0xff] }
 0x132   :  { %1655 = vmatmul.mubr.msk.f32.vlgmr.msra.gmra.mrb[2].mxu1 %vm84_vm0, %v2147_v7 }
 0x133   :  { %1800 = vmatpush3.bf16.msra.mxu1 %v1797_v26  ;;  %1672 = vmatprep.mubr.msk.f32.mxu1 %vm84_vm0, %v2145_v6 }
 0x134   :  { %1802 = vmatprep.subr.bf16.mxu1 %v1801_v29 }
 0x137   :  { %1804 = vmatpush3.bf16.msra.mxu1 %v1801_v29 }
 0x138   :  { %1814 = vmatprep.subr.bf16.mxu1 %v1813_v49 }
 0x13a   :  { %1673 = vmatmul.mubr.msk.f32.vlgmr.msra.gmra.mrb[4].mxu1 %vm84_vm0, %v2147_v7 }
 0x13b   :  { %1697 = vmatprep.mubr.msk.f32.mxu1 %vm84_vm0, %v2145_v6  ;;  %1816 = vmatpush3.bf16.msra.mxu1 %v1813_v49 }
 0x13c   :  { %1818 = vmatprep.subr.bf16.mxu1 %v1817_v51 }
 0x13f   :  { %1820 = vmatpush3.bf16.msra.mxu1 %v1817_v51 }
 0x142   :  { %1698 = vmatmul.mubr.msk.f32.vlgmr.msra.gmra.mrb[6].mxu1 %vm84_vm0, %v2147_v7 }
 0x143   :  { %1715 = vmatprep.mubr.msk.f32.mxu1 %vm84_vm0, %v2145_v6 }
 0x1fd   :  { %v1634_v31 = vpop.f32.mrb[0].mxu1 }
 0x1fe   :  { %v238_v33 = vpop.f32.mrb[1].mxu1  ;;  %v244_v35 = vadd.f32 %v1634_v31, %v2187_v32 }
 0x1ff   :  { %v239_v34 = vadd.f32 %v238_v33, %v2185_v30 }
 0x200   :  { %v251_v38 = vsel %vm247_vm2, %v244_v35, -inf }
 0x201   :  { %v248_v36 = vsel %vm247_vm2, %v239_v34, -inf }
 0x202   :  { %249 = vmax.xlane.f32.xlu1 %v248_v36  ;;  %v960_v36 = vld [vmem:[#allocation7 + $0x50] sm:$0xff] }
 0x205   :  { %v1656_v37 = vpop.f32.mrb[2].mxu1 }
 0x206   :  { %v420_v39 = vpop.f32.mrb[3].mxu1  ;;  %252 = vmax.xlane.f32.xlu1 %v251_v38  ;;  %v961_v38 = vld [vmem:[#allocation7 + $0x58] sm:$0xff] }
 0x207   :  { %1661 = vmatprep.mubr.msk.f32.mxu0 %vm84_vm0, %v420_v39  ;;  %v1831_v39 = vpack.c.bf16 %v961_v38, %v960_v36 }
 0x208   :  { %1662 = vmatmul.mubr.msk.f32.vlgmr.msra.gmra.mrb[4].mxu0 %vm84_vm0, %v1656_v37 }
 0x20d   :  { %v1674_v40 = vpop.f32.mrb[4].mxu1 }
 0x20e   :  { %v603_v42 = vpop.f32.mrb[5].mxu1 }
 0x20f   :  { %v1805_v44 = vpack.c.bf16 %v1674_v40, %v603_v42  ;;  %v1121_v40 = vld [vmem:[#allocation5 + $0x60] sm:$0xff] }
 0x210   :  { %v1839_v42 = vpack.c.bf16 %v1122_v41, %v1121_v40  ;;  %v1536_v40 = vld [vmem:[%s2281_s4] ss:$0 sm:$0xff] }
 0x211   :  { %1806 = vmatprep.subr.bf16.mxu0 %v1805_v44 }
 0x212   :  { %1808 = vmatpush3.bf16.msra.mxu0 %v1805_v44  ;;  %v1124_v44 = vld [vmem:[#allocation5 + $0x78] sm:$0xff] }
 0x213   :  { %1810 = vmatprep.subr.bf16.mxu0 %v2195_v45 }
 0x215   :  { %v1699_v18 = vpop.f32.mrb[6].mxu1 }
 0x216   :  { %v845_v19 = vpop.f32.mrb[7].mxu1 }
 0x28f   :  { %v250_v58 = vpop.xlane.xlu1 %249 }
 0x290   :  { %v254_v59 = vsub.f32 %v239_v34, %v250_v58  ;;  %v958_v34 = vld [vmem:[#allocation7 + $0x40] sm:$0xff] }
 0x292   :  { %v256_v63 = vmul.f32 1.442695, %v254_v59 }
 0x293   :  { %v253_v60 = vpop.xlane.xlu1 %252 }
 0x294   :  { %v255_v1 = vsub.f32 %v244_v35, %v253_v60  ;;  %v959_v35 = vld [vmem:[#allocation7 + $0x48] sm:$0xff] }
 0x295   :  { %v1827_v37 = vpack.c.bf16 %v959_v35, %v958_v34 }
 0x296   :  { %v258_v5 = vmul.f32 1.442695, %v255_v1 }
 0x297   :  { %1828 = vmatprep.subr.bf16.mxu1 %v1827_v37 }
 0x298   :  { %1830 = vmatpush3.bf16.msra.mxu1 %v1827_v37 }
 0x299   :  { %1832 = vmatprep.subr.bf16.mxu1 %v1831_v39 }
 0x29c   :  { %1834 = vmatpush3.bf16.msra.mxu1 %v1831_v39 }
 0x29d   :  { %1840 = vmatprep.subr.bf16.mxu1 %v1839_v42 }
 0x29f   :  { %1716 = vmatmul.mubr.msk.f32.vlgmr.msra.gmra.mrb[8].mxu1 %vm84_vm0, %v2147_v7 }
 0x2a0   :  { %1842 = vmatpush3.bf16.msra.mxu1 %v1839_v42  ;;  %1733 = vmatprep.mubr.msk.f32.mxu1 %vm84_vm0, %v2145_v6 }
 0x2db   :  { %v1663_v52 = vpop.f32.mrb[4].mxu0 }
 0x2dc   :  { %v501_v53 = vpop.f32.mrb[5].mxu0  ;;  %v507_v55 = vadd.f32 %v1663_v52, %v2187_v32 }
 0x2dd   :  { %v502_v54 = vadd.f32 %v501_v53, %v2185_v30 }
 0x2de   :  { %v513_v57 = vsel %vm247_vm2, %v507_v55, -inf }
 0x2df   :  { %v510_v56 = vsel %vm247_vm2, %v502_v54, -inf }
 0x2e0   :  { %511 = vmax.xlane.f32.xlu0 %v510_v56 }
 0x2e4   :  { %514 = vmax.xlane.f32.xlu0 %v513_v57 }
 0x36d   :  { %v512_v61 = vpop.xlane.xlu0 %511 }
 0x36e   :  { %v516_v62 = vsub.f32 %v502_v54, %v512_v61 }
 0x370   :  { %v518_v2 = vmul.f32 1.442695, %v516_v62 }
 0x371   :  { %v515_v3 = vpop.xlane.xlu0 %514 }
 0x372   :  { %1878 = vpow2.f32 %v518_v2  ;;  %v517_v4 = vsub.f32 %v507_v55, %v515_v3  ;;  %v1717_v52 = vpop.f32.mrb[8].mxu1 }
 0x373   :  { %1880 = vpow2.f32 %v256_v63  ;;  %v1028_v62 = vpop.f32.mrb[9].mxu1 }
 0x374   :  { %v520_v8 = vmul.f32 1.442695, %v517_v4  ;;  %v1835_v63 = vpack.c.bf16 %v1717_v52, %v1028_v62 }
 0x376   :  { %1882 = vpow2.f32 %v520_v8 }
 0x377   :  { %1884 = vpow2.f32 %v258_v5 }
 0x37c   :  { %v1879_v10 = vpop.eup %1878 }
 0x37d   :  { %v522_v11 = vsel %vm247_vm2, %v1879_v10, 0.0  ;;  %v1881_v12 = vpop.eup %1880 }
 0x37e   :  { %523 = vadd.xlane.f32.xlu0 %v522_v11  ;;  %v260_v15 = vsel %vm247_vm2, %v1881_v12, 0.0 }
 0x380   :  { %v1883_v13 = vpop.eup %1882 }
 0x381   :  { %v525_v14 = vsel %vm247_vm2, %v1883_v13, 0.0  ;;  %v1885_v16 = vpop.eup %1884 }
 0x382   :  { %526 = vadd.xlane.f32.xlu1 %v525_v14  ;;  %261 = vadd.xlane.f32.xlu0 %v260_v15  ;;  %v263_v17 = vsel %vm247_vm2, %v1885_v16, 0.0  ;;  %v1306_v14 = vld [vmem:[#allocation7 + $0x70] sm:$0xff] }
 0x386   :  { %264 = vadd.xlane.f32.xlu1 %v263_v17 }
 0x40b   :  { %v524_v20 = vpop.xlane.xlu0 %523 }
 0x40c   :  { %1886 = vrcp.f32 %v524_v20 }
 0x40f   :  { %v262_v21 = vpop.xlane.xlu0 %261  ;;  %v527_v22 = vpop.xlane.xlu1 %526 }
 0x410   :  { %1888 = vrcp.f32 %v262_v21 }
 0x411   :  { %1890 = vrcp.f32 %v527_v22 }
 0x413   :  { %v265_v23 = vpop.xlane.xlu1 %264 }
 0x414   :  { %1892 = vrcp.f32 %v265_v23 }
 0x416   :  { %v1887_v24 = vpop.eup %1886 }
 0x417   :  { %v529_v25 = vmul.f32 %v1887_v24, %v1879_v10 }
 0x419   :  { %1679 = vmatprep.mubr.msk.f32.mxu0 %vm247_vm2, %v529_v25 }
 0x41a   :  { %v1889_v26 = vpop.eup %1888 }
 0x41b   :  { %v1891_v27 = vpop.eup %1890  ;;  %v267_v28 = vmul.f32 %v1889_v26, %v1881_v12  ;;  %v1304_v12 = vld [vmem:[#allocation7 + $0x60] sm:$0xff] }
 0x41c   :  { %v531_v29 = vmul.f32 %v1891_v27, %v1883_v13  ;;  %v1305_v13 = vld [vmem:[#allocation7 + $0x68] sm:$0xff] }
 0x41d   :  { %v1853_v15 = vpack.c.bf16 %v1305_v13, %v1304_v12 }
 0x41e   :  { %1680 = vmatmul.mubr.msk.f32.vlgmr.msra.gmra.mrb[6].mxu0 %vm247_vm2, %v531_v29  ;;  %v1893_v31 = vpop.eup %1892 }
 0x41f   :  { %1812 = vmatpush3.bf16.msra.mxu0 %v2195_v45  ;;  %1686 = vmatprep.mubr.msk.f32.mxu0 %vm247_vm2, %v267_v28  ;;  %v269_v33 = vmul.f32 %v1893_v31, %v1885_v16  ;;  %v1843_v45 = vpack.c.bf16 %v1124_v44, %v1123_v43  ;;  %v1307_v16 = vld [vmem:[#allocation7 + $0x78] sm:$0xff] }
 0x420   :  { %1823 = vmatprep.subr.msk.bf16.mxu0 %vm2141_vm1, %v2153_v9  ;;  %v1857_v17 = vpack.c.bf16 %v1307_v16, %v1306_v14 }
 0x421   :  { %1844 = vmatprep.subr.bf16.mxu1 %v1843_v45 }
 0x422   :  { %1846 = vmatpush3.bf16.msra.mxu1 %v1843_v45 }
 0x423   :  { %1854 = vmatprep.subr.bf16.mxu1 %v1853_v15 }
 0x425   :  { %1734 = vmatmul.mubr.msk.f32.vlgmr.msra.gmra.mrb[10].mxu1 %vm84_vm0, %v2147_v7 }
 0x426   :  { %1687 = vmatmul.mubr.msk.f32.vlgmr.msra.gmra.mrb[6].mxu0 %vm247_vm2, %v269_v33  ;;  %1751 = vmatprep.mubr.msk.f32.mxu1 %vm84_vm0, %v2145_v6 }
 0x427   :  { %1704 = vmatprep.mubr.msk.f32.mxu0 %vm84_vm0, %v845_v19  ;;  %1856 = vmatpush3.bf16.msra.mxu1 %v1853_v15 }
 0x428   :  { %1826 = vmatpush3.bf16.xpose.msk.msra.mxu0 %vm2141_vm1, %v2153_v9  ;;  %1858 = vmatprep.subr.bf16.mxu1 %v1857_v17 }
 0x429   :  { %1836 = vmatprep.subr.bf16.mxu0 %v1835_v63 }
 0x42b   :  { %1860 = vmatpush3.bf16.msra.mxu1 %v1857_v17 }
 0x42e   :  { %1752 = vmatmul.mubr.msk.f32.vlgmr.msra.gmra.mrb[12].mxu1 %vm84_vm0, %v2147_v7 }
 0x42f   :  { %1705 = vmatmul.mubr.msk.f32.vlgmr.msra.gmra.mrb[8].mxu0 %vm84_vm0, %v1699_v18 }
 0x430   :  { %1838 = vmatpush3.bf16.msra.mxu0 %v1835_v63 }
 0x431   :  { %1849 = vmatprep.subr.msk.bf16.mxu0 %vm2141_vm1, %v2153_v9 }
 0x4f8   :  { %v1735_v1 = vpop.f32.mrb[10].mxu1 }
 0x4f9   :  { %v1191_v2 = vpop.f32.mrb[11].mxu1 }
 0x501   :  { %v1753_v29 = vpop.f32.mrb[12].mxu1 }
 0x502   :  { %v1706_v46 = vpop.f32.mrb[8].mxu0  ;;  %v1374_v31 = vpop.f32.mrb[13].mxu1 }
 0x503   :  { %v932_v47 = vadd.f32 %v1706_v46, %v2187_v32  ;;  %v926_v48 = vpop.f32.mrb[9].mxu0  ;;  %v1861_v33 = vpack.c.bf16 %v1753_v29, %v1374_v31 }
 0x504   :  { %v927_v49 = vadd.f32 %v926_v48, %v2185_v30 }
 0x505   :  { %v938_v50 = vsel %vm247_vm2, %v932_v47, -inf }
 0x506   :  { %939 = vmax.xlane.f32.xlu1 %v938_v50  ;;  %v935_v51 = vsel %vm247_vm2, %v927_v49, -inf }
 0x507   :  { %936 = vmax.xlane.f32.xlu0 %v935_v51 }
 0x593   :  { %v940_v53 = vpop.xlane.xlu1 %939 }
 0x594   :  { %v942_v54 = vsub.f32 %v932_v47, %v940_v53  ;;  %v937_v55 = vpop.xlane.xlu0 %936 }
 0x595   :  { %v941_v56 = vsub.f32 %v927_v49, %v937_v55 }
 0x596   :  { %v945_v57 = vmul.f32 1.442695, %v942_v54 }
 0x597   :  { %v943_v58 = vmul.f32 1.442695, %v941_v56 }
 0x598   :  { %1894 = vpow2.f32 %v945_v57 }
 0x599   :  { %1896 = vpow2.f32 %v943_v58 }
 0x5a2   :  { %v1895_v6 = vpop.eup %1894 }
 0x5a3   :  { %v1897_v59 = vpop.eup %1896  ;;  %v950_v60 = vsel %vm247_vm2, %v1895_v6, 0.0 }
 0x5a4   :  { %951 = vadd.xlane.f32.xlu1 %v950_v60  ;;  %v947_v61 = vsel %vm247_vm2, %v1897_v59, 0.0 }
 0x5a5   :  { %948 = vadd.xlane.f32.xlu0 %v947_v61 }
 0x631   :  { %v952_v3 = vpop.xlane.xlu1 %951 }
 0x632   :  { %1898 = vrcp.f32 %v952_v3  ;;  %v949_v4 = vpop.xlane.xlu0 %948 }
 0x633   :  { %1900 = vrcp.f32 %v949_v4 }
 0x63c   :  { %v1899_v5 = vpop.eup %1898 }
 0x63d   :  { %v1901_v8 = vpop.eup %1900  ;;  %v956_v11 = vmul.f32 %v1899_v5, %v1895_v6 }
 0x63e   :  { %v954_v10 = vmul.f32 %v1901_v8, %v1897_v59 }
 0x640   :  { %1722 = vmatprep.mubr.msk.f32.mxu0 %vm247_vm2, %v954_v10 }
 0x641   :  { %1723 = vmatmul.mubr.msk.f32.vlgmr.msra.gmra.mrb[6].mxu0 %vm247_vm2, %v956_v11 }
 0x642   :  { %1852 = vmatpush3.bf16.xpose.msk.msra.mxu0 %vm2141_vm1, %v2153_v9  ;;  %1740 = vmatprep.mubr.msk.f32.mxu0 %vm84_vm0, %v1191_v2 }
 0x643   :  { %1862 = vmatprep.subr.bf16.mxu0 %v1861_v33 }
 0x649   :  { %1741 = vmatmul.mubr.msk.f32.vlgmr.msra.gmra.mrb[10].mxu0 %vm84_vm0, %v1735_v1 }
 0x64a   :  { %1864 = vmatpush3.bf16.msra.mxu0 %v1861_v33 }
 0x71c   :  { %v1742_v18 = vpop.f32.mrb[10].mxu0 }
 0x71d   :  { %v1278_v0 = vadd.f32 %v1742_v18, %v2187_v32  ;;  %v1272_v9 = vpop.f32.mrb[11].mxu0 }
 0x71e   :  { %v1273_v19 = vadd.f32 %v1272_v9, %v2185_v30 }
 0x71f   :  { %v1284_v20 = vsel %vm247_vm2, %v1278_v0, -inf }
 0x720   :  { %1285 = vmax.xlane.f32.xlu1 %v1284_v20  ;;  %v1281_v21 = vsel %vm247_vm2, %v1273_v19, -inf }
 0x721   :  { %1282 = vmax.xlane.f32.xlu0 %v1281_v21 }
 0x7ad   :  { %v1286_v22 = vpop.xlane.xlu1 %1285 }
 0x7ae   :  { %v1288_v23 = vsub.f32 %v1278_v0, %v1286_v22  ;;  %v1283_v24 = vpop.xlane.xlu0 %1282 }
 0x7af   :  { %v1287_v25 = vsub.f32 %v1273_v19, %v1283_v24 }
 0x7b0   :  { %v1291_v26 = vmul.f32 1.442695, %v1288_v23 }
 0x7b1   :  { %v1289_v27 = vmul.f32 1.442695, %v1287_v25 }
 0x7b2   :  { %1902 = vpow2.f32 %v1291_v26 }
 0x7b3   :  { %1904 = vpow2.f32 %v1289_v27 }
 0x7bc   :  { %v1903_v7 = vpop.eup %1902 }
 0x7bd   :  { %v1905_v28 = vpop.eup %1904  ;;  %v1296_v32 = vsel %vm247_vm2, %v1903_v7, 0.0 }
 0x7be   :  { %1297 = vadd.xlane.f32.xlu1 %v1296_v32  ;;  %v1293_v30 = vsel %vm247_vm2, %v1905_v28, 0.0 }
 0x7bf   :  { %1294 = vadd.xlane.f32.xlu0 %v1293_v30 }
 0x84b   :  { %v1298_v34 = vpop.xlane.xlu1 %1297 }
 0x84c   :  { %1906 = vrcp.f32 %v1298_v34  ;;  %v1295_v35 = vpop.xlane.xlu0 %1294 }
 0x84d   :  { %1908 = vrcp.f32 %v1295_v35 }
 0x856   :  { %v1907_v36 = vpop.eup %1906 }
 0x857   :  { %v1909_v37 = vpop.eup %1908  ;;  %v1302_v39 = vmul.f32 %v1907_v36, %v1903_v7 }
 0x858   :  { %v1300_v38 = vmul.f32 %v1909_v37, %v1905_v28 }
 0x85a   :  { %1758 = vmatprep.mubr.msk.f32.mxu0 %vm247_vm2, %v1300_v38 }
 0x85b   :  { %1759 = vmatmul.mubr.msk.f32.vlgmr.msra.gmra.mrb[6].mxu0 %vm247_vm2, %v1302_v39 }
 0x92e   :  { %v1760_v41 = vpop.f32.mrb[6].mxu0 }
 0x92f   :  { %v1474_v42 = vadd.f32 %v1760_v41, %v1536_v40  ;;  %v1455_v43 = vpop.f32.mrb[7].mxu0 }
 0x930   :  { %v1473_v44 = vadd.f32 %v1536_v40, %v1455_v43 }
 0x931   :  { %1476 = vst.msk [vmem:[#allocation10 + $0x8] sm:$0xff] %vm84_vm0, %v1474_v42 }
 0x932   :  { %1475 = vst.msk [vmem:[#allocation10] sm:$0xff] %vm84_vm0, %v1473_v44 }
 0x933   :  { %2009 = shalt.err (!%p2006_p8)
}
 0x934   :  { %s2010_s22 = scalar_lea.hbm %s2282_s5, 256 }
 0x935   :  { %p2011_p9 = scmp.ne.s32.totalorder %s2282_s5, %s2010_s22  ;;  %p2014_p10 = scmp.lt.u32.totalorder %s2010_s22, %s2282_s5 }
 0x937   :  { %p2016_p11 = pnand %p2014_p10, %p2011_p9 }
 0x939   :  { %2019 = shalt.err (!%p2016_p11)
}
 0x93a   :  { %1488 = dma.vmem_to_hbm [thread:$0]  %s1483_s18, 256, %s2282_s5, [#allocation4], %s2030_s30, %s2030_s30, %s2031_s6  }
 0x93b   :  { %2026 = dma.done.wait [#allocation4], 256  }
 0x93c   :  { %2027 = vsyncadd [#allocation4], 4294967040 }
 0x93d   :  { %1492 = vsyncpa [#allocation3], 1 }
 0x93e   :  { %1493 = vsyncpa [#allocation6], 1 }
 0x93f   :  { %1494 = vsyncpa [#allocation9], 1 }
 0x940   :  { %1495 = vsyncpa [#allocation4], 1 }

</bundles_post_ra>
